<compile_context>
chip_gen: v7x
topology: tpu7x:2x2x1
jax: 0.10.0
libtpu: 0.0.40
codegen_flags: <defaults>
</compile_context>

<pallas_src>
import jax
import jax.numpy as jnp
import numpy as np
from jax.experimental import pallas as pl
from jax.experimental.pallas import tpu as pltpu


def _pool_matrix(length: int) -> np.ndarray:
    """(Lout, L) 0/1 matrix of one AvgPool2d(3, s=2, p=1) stage along one axis."""
    lout = (length - 1) // 2 + 1
    rows = np.arange(lout)[:, None]
    cols = np.arange(length)[None, :]
    off = cols - 2 * rows                       # window offsets -1, 0, +1
    return ((off >= -1) & (off <= 1)).astype(np.float64)


def _composed_pool_matrices(h: int, w: int, sampling_times: int):
    """Compose samplingTimes separable pooling stages.

    Returns (bh_scaled, bw) where bh_scaled already carries the (1/9)^T
    divisor (count_include_pad=True => divisor is always 9 per stage).
    """
    bh = np.eye(h, dtype=np.float64)
    bw = np.eye(w, dtype=np.float64)
    for _ in range(sampling_times):
        bh = _pool_matrix(bh.shape[0]) @ bh
        bw = _pool_matrix(bw.shape[0]) @ bw
    scale = (1.0 / 9.0) ** sampling_times
    return (bh * scale).astype(np.float32), bw.astype(np.float32)


def _pool_kernel(x_ref, bwt_ref, bhb_ref, o_ref):
    # x_ref:   (P, H, W)    input planes for this grid step
    # bwt_ref: (W, Wo)      composed column-pool matrix, pre-transposed
    # bhb_ref: (P, Ho, H)   composed row-pool matrix (scale folded), batched
    # o_ref:   (P, Ho, Wo)
    p, h, w = x_ref.shape
    wo = bwt_ref.shape[1]

    # W contraction: one big (P*H, W) @ (W, Wo) MXU matmul.  The (P, H) merge
    # is a pure leading-dim collapse (H is a multiple of 8 for image sizes).
    t = jnp.dot(x_ref[...].reshape(p * h, w), bwt_ref[...],
                preferred_element_type=jnp.float32)           # (P*H, Wo)

    # H contraction on the already-2**T-smaller data: batched matmul
    # (P, Ho, H) x (P, H, Wo) -> (P, Ho, Wo).
    y = jnp.einsum('poh,phw->pow', bhb_ref[...], t.reshape(p, h, wo),
                   preferred_element_type=jnp.float32)        # (P, Ho, Wo)

    o_ref[...] = y.astype(o_ref.dtype)                        # pure cast+store


def _choose_plane_block(planes, h, w, ho, wo, itemsize, budget_bytes):
    """Largest divisor P of `planes` whose working set fits the VMEM budget."""
    per_plane = (2 * itemsize * (h * w + ho * wo)     # double-buffered in/out blocks
                 + 4 * (ho * h + h * wo + ho * wo))   # bh_b slice + intermediates (f32)
    fixed = 4 * (w * wo)                              # resident bwt
    p_cap = max(1, int((budget_bytes - fixed) // per_plane))
    if planes >= 2:
        p_cap = min(p_cap, planes // 2)   # keep >= 2 grid steps (megacore / pipelining)
    p_cap = min(p_cap, planes)
    for cand in range(p_cap, 0, -1):
        if planes % cand == 0:
            return cand
    return 1


def input_projection_a(x_nchw, sampling_times: int):
    """Forward of InputProjectionA: samplingTimes x AvgPool2d(3, stride=2, padding=1)."""
    if sampling_times == 0:
        return x_nchw

    n, c, h, w = x_nchw.shape
    bh, bw = _composed_pool_matrices(h, w, sampling_times)    # scale folded into bh
    ho, wo = bh.shape[0], bw.shape[0]
    planes = n * c
    itemsize = jnp.dtype(x_nchw.dtype).itemsize

    # Per-generation VMEM sizing (v7x: 64 MiB/TC, v5e/v6e: 128 MiB).
    try:
        vmem_total = int(pltpu.get_tpu_info().vmem_capacity_bytes)
    except Exception:
        vmem_total = 64 << 20                                 # conservative default
    vmem_limit = min(vmem_total * 3 // 4, 100 << 20)          # raise scoped VMEM limit
    budget = vmem_total // 2                                  # headroom for compiler/scratch

    p = _choose_plane_block(planes, h, w, ho, wo, itemsize, budget)

    x_flat = x_nchw.reshape(planes, h, w)                     # pure view, no transpose
    bwt_j = jnp.asarray(bw.T)                                 # (W, Wo), exact 0/1
    # Broadcast of bh over the plane batch, hoisted out of the grid loop and
    # kept resident via a constant index_map (no per-step VPU broadcast).
    bhb_j = jnp.asarray(np.ascontiguousarray(
        np.broadcast_to(bh[None], (p, ho, h))))               # (P, Ho, H)

    cost = pl.CostEstimate(
        flops=2 * planes * (h * w * wo + ho * h * wo),
        transcendentals=0,
        bytes_accessed=itemsize * planes * (h * w + ho * wo)
        + 4 * (w * wo + p * ho * h),
    )

    out_flat = pl.pallas_call(
        _pool_kernel,
        out_shape=jax.ShapeDtypeStruct((planes, ho, wo), x_nchw.dtype),
        grid=(planes // p,),
        in_specs=[
            pl.BlockSpec((p, h, w), lambda i: (i, 0, 0)),     # P planes per step (pipelined DMA)
            pl.BlockSpec((w, wo), lambda i: (0, 0)),          # resident composed col-pool matrix
            pl.BlockSpec((p, ho, h), lambda i: (0, 0, 0)),    # resident batched row-pool matrix
        ],
        out_specs=pl.BlockSpec((p, ho, wo), lambda i: (i, 0, 0)),
        compiler_params=pltpu.CompilerParams(
            dimension_semantics=("parallel",),
            vmem_limit_bytes=int(vmem_limit)),
        cost_estimate=cost,
    )(x_flat, bwt_j, bhb_j)

    return out_flat.reshape(n, c, ho, wo)


def _reference(x_nchw, sampling_times):
    """Independent JAX reference: per-stage AvgPool2d(3, s=2, p=1), count_include_pad=True."""
    out = x_nchw
    for _ in range(sampling_times):
        s = jax.lax.reduce_window(
            out, 0.0, jax.lax.add,
            window_dimensions=(1, 1, 3, 3),
            window_strides=(1, 1, 2, 2),
            padding=((0, 0), (0, 0), (1, 1), (1, 1)))
        out = s / 9.0
    return out


if __name__ == "__main__":
    N, C, H, W = 2, 3, 16, 16          # RGB image, as the module's forward implies
    SAMPLING_TIMES = 2                  # InputProjectionA(samplingTimes=2): 16x16 -> 8x8 -> 4x4

    key = jax.random.PRNGKey(0)
    x = jax.random.normal(key, (N, C, H, W), dtype=jnp.float32)

    out = input_projection_a(x, SAMPLING_TIMES)
    out = jax.block_until_ready(out)

    ref = _reference(x, SAMPLING_TIMES)
    assert out.shape == (N, C, 4, 4), out.shape
    # DEFAULT-precision MXU f32 matmuls; the pool matrices are exact small
    # integers times (1/9)^T, so any semantic error in windows/divisor would
    # be orders of magnitude larger than this tolerance.
    assert jnp.allclose(out, ref, atol=2e-3, rtol=2e-3), float(
        jnp.max(jnp.abs(out - ref)))

    print("KERNEL_OK")
</pallas_src>

<mosaic_0001>
module attributes {stable_mosaic.version = 11 : i64} {
  func.func @_pool_kernel(%arg0: i32, %arg1: memref<3x16x16xf32, #tpu.memory_space<vmem>>, %arg2: memref<16x4xf32, #tpu.memory_space<vmem>>, %arg3: memref<3x4x16xf32, #tpu.memory_space<vmem>>, %arg4: memref<3x4x4xf32, #tpu.memory_space<vmem>>) attributes {dimension_semantics = [#tpu.dimension_semantics<parallel>], iteration_bounds = array<i64: 2>, scalar_prefetch = 0 : i64, scratch_operands = 0 : i64, tpu.core_type = #tpu.core_type<tc>, window_params = [{transform_indices = @transform_0, window_bounds = array<i64: 3, 16, 16>}, {pipeline_mode = #tpu.pipeline_mode<synchronous>, transform_indices = @transform_1, window_bounds = array<i64: 16, 4>}, {pipeline_mode = #tpu.pipeline_mode<synchronous>, transform_indices = @transform_2, window_bounds = array<i64: 3, 4, 16>}, {transform_indices = @transform_3, window_bounds = array<i64: 3, 4, 4>}]} {
    %c0 = arith.constant 0 : index
    %c0_0 = arith.constant 0 : index
    %c0_1 = arith.constant 0 : index
    %0 = vector.load %arg1[%c0, %c0_0, %c0_1] : memref<3x16x16xf32, #tpu.memory_space<vmem>>, vector<3x16x16xf32>
    %1 = vector.shape_cast %0 : vector<3x16x16xf32> to vector<48x16xf32>
    %c0_2 = arith.constant 0 : index
    %c0_3 = arith.constant 0 : index
    %2 = vector.load %arg2[%c0_2, %c0_3] : memref<16x4xf32, #tpu.memory_space<vmem>>, vector<16x4xf32>
    %cst = arith.constant dense<0.000000e+00> : vector<48x4xf32>
    %3 = tpu.matmul %1, %2, %cst {dimension_numbers = #tpu.dot_dimension_numbers<[1], [0], [0], [1], [0, 0, 1, 1], [], []>} : vector<48x16xf32>, vector<16x4xf32>, vector<48x4xf32> -> vector<48x4xf32>
    %c0_4 = arith.constant 0 : index
    %c0_5 = arith.constant 0 : index
    %c0_6 = arith.constant 0 : index
    %4 = vector.load %arg3[%c0_4, %c0_5, %c0_6] : memref<3x4x16xf32, #tpu.memory_space<vmem>>, vector<3x4x16xf32>
    %5 = vector.shape_cast %3 : vector<48x4xf32> to vector<3x16x4xf32>
    "tpu.trace_start"() <{level = 10 : i32, message = "poh,phw->pow"}> : () -> ()
    %cst_7 = arith.constant dense<0.000000e+00> : vector<3x4x4xf32>
    %6 = tpu.matmul %4, %5, %cst_7 {dimension_numbers = #tpu.dot_dimension_numbers<[2], [1], [1], [2], [0, 0, 0, 1, 1, 2], [0], [0]>} : vector<3x4x16xf32>, vector<3x16x4xf32>, vector<3x4x4xf32> -> vector<3x4x4xf32>
    "tpu.trace_stop"() : () -> ()
    %c0_8 = arith.constant 0 : index
    %c0_9 = arith.constant 0 : index
    %c0_10 = arith.constant 0 : index
    %7 = vector.load %arg4[%c0_8, %c0_9, %c0_10] : memref<3x4x4xf32, #tpu.memory_space<vmem>>, vector<3x4x4xf32>
    tpu.vector_store %arg4[%c0_8, %c0_9, %c0_10], %6 {strides = array<i32>} : memref<3x4x4xf32, #tpu.memory_space<vmem>>, vector<3x4x4xf32>,
    return
  }
  func.func @transform_0(%arg0: i32) -> (i32, i32, i32) {
    %c0_i32 = arith.constant 0 : i32
    %c0_i32_0 = arith.constant 0 : i32
    %c0_i32_1 = arith.constant 0 : i32
    return %arg0, %c0_i32, %c0_i32_0 : i32, i32, i32
  }
  func.func @transform_1(%arg0: i32) -> (i32, i32) {
    %c0_i32 = arith.constant 0 : i32
    %c0_i32_0 = arith.constant 0 : i32
    %c0_i32_1 = arith.constant 0 : i32
    return %c0_i32, %c0_i32_0 : i32, i32
  }
  func.func @transform_2(%arg0: i32) -> (i32, i32, i32) {
    %c0_i32 = arith.constant 0 : i32
    %c0_i32_0 = arith.constant 0 : i32
    %c0_i32_1 = arith.constant 0 : i32
    %c0_i32_2 = arith.constant 0 : i32
    return %c0_i32, %c0_i32_0, %c0_i32_1 : i32, i32, i32
  }
  func.func @transform_3(%arg0: i32) -> (i32, i32, i32) {
    %c0_i32 = arith.constant 0 : i32
    %c0_i32_0 = arith.constant 0 : i32
    %c0_i32_1 = arith.constant 0 : i32
    return %arg0, %c0_i32, %c0_i32_0 : i32, i32, i32
  }
}

</mosaic_0001>

<bundles_post_ra>
// kernel: tpu_custom_call.1
= control target key start
LH: loop header
LB: loop body
LE: loop exit
PB: predicated region body
PF: predicated region fallthrough
CT: control target
= control target key end

     0   :  { %8 = vsyncpa [#allocation3], 0  ;;  %s967_s0 = inlined_call_operand.hbm [shape: f32[6,16,16], index: 0, kind: input, shape index: {}]   ;;  %s968_s1 = inlined_call_operand.vmem [shape: f32[16,4], index: 1, kind: input, shape index: {}]   ;;  %s969_s2 = inlined_call_operand.vmem [shape: f32[3,4,16], index: 2, kind: input, shape index: {}]   ;;  %s970_s3 = inlined_call_operand.vmem [shape: f32[6,4,4], index: 3, kind: output, shape index: {}]  }
   0x1   :  { %10 = vsyncpa [#allocation3 + $0x1], 0  ;;  %s833_s12 = smov 0   ;;  %s835_s13 = smov 0  }
   0x2   :  { %s837_s14 = smov 0   ;;  %s839_s15 = smov 0  }
   0x3 LB: > { %s609_s16 = sadd.s32 4294967295, %s805_s15   ;;  %s853_s17 = sadd.s32 1, %s805_s15   ;;  %s805_s15 = sphi %s839_s15, %s977_s15   ;;  %s801_s14 = sphi %s837_s14, %s976_s14   ;;  %s797_s13 = sphi %s835_s13, %s975_s13   ;;  %s793_s12 = sphi %s833_s12, %s974_s12  }
   0x4   : > { %s20_s18 = ssub.s32 %s805_s15, %s853_s17  ;;  %s23_s19 = sadd.s32 1, %s801_s14 }
   0x5   : > { %p21_p0 = scmp.eq.s32.totalorder %s20_s18, 0  ;;  %p30_p1 = scmp.ne.s32.totalorder %s801_s14, %s797_s13 }
   0x6   : > { %p31_p2 = scmp.eq.s32.totalorder %s805_s15, 0  ;;  %p36_p3 = scmp.ne.s32.totalorder %s797_s13, %s793_s12 }
   0x7   : > { %s863_s20 = scalar_select %p21_p0, %s801_s14, %s23_s19  }
   0x8   : > { %p32_p4 = por %p31_p2, %p30_p1  ;;  %p37_p5 = scmp.eq.s32.totalorder %s609_s16, 0 }
   0x9   : > { %p703_p6 = scmp.lt.s32.totalorder %s805_s15, 2  ;;  %s134_s22 = sand.u32 1, %s801_s14  }
   0xa   : > { %p868_p7 = por %p37_p5, %p36_p3  ;;  %s695_s23 = smul.u32 48, %s134_s22 }
   0xb   : > { %s630_s24 = smul.u32 768, %s805_s15  ;;  %p874_p8 = pnand %p703_p6, %p32_p4 }
   0xc   : > { %s138_s29 = scalar_lea.vmem [#allocation2], %s695_s23  ;;  %s886_s4 = scalar_lea.sflag [#allocation3], %s134_s22 }
   0xd   : > { %s881_s28 = scalar_lea.hbm %s967_s0, %s630_s24  ;;  %s146_s30 = sshll.u32 %s138_s29, 4  ;;  %s883_s30 = int_to_ptr.vmem [resolvable:$true] %s146_s30 }
   0xe   : > { %s741_s5 = scalar_lea.hbm %s881_s28, 768  ;;  %p743_p11 = pneg %p874_p8 }
   0xf   : > { %p742_p10 = scmp.ne.s32.totalorder %s881_s28, %s741_s5  ;;  %s746_s8 = scalar_lea.hbm %s967_s0, 1536 }
  0x10   : > { %p747_p0 = scmp.lt.u32.totalorder %s881_s28, %s967_s0  ;;  %p748_p1 = scmp.lt.u32.totalorder %s746_s8, %s741_s5 }
  0x11   : > { %p744_p12 = pnand %p743_p11, %p742_p10  ;;  %p750_p3 = scmp.lt.u32.totalorder %s741_s5, %s881_s28 }
  0x12   : > { %p749_p2 = por %p748_p1, %p747_p0 }
  0x13   : > { %p745_p13 = pneg %p744_p12 }
  0x14   : > { %p751_p4 = por %p750_p3, %p749_p2 }
  0x16   : > { %p752_p5 = pnand %p751_p4, %p745_p13 }
  0x18   : > { %755 = shalt.err (!%p752_p5)
}
  0x19   : > { %s756_s11 = scalar_lea.vmem %s883_s30, 768  ;;  %s807_s12 = smov [#allocation2]  }
  0x1a   : > { %p757_p6 = scmp.ne.s32.totalorder %s883_s30, %s756_s11  ;;  %s761_s18 = sshll.u32 %s807_s12, 4  ;;  %s762_s18 = int_to_ptr.vmem [resolvable:$false] %s761_s18 }
  0x1b   : > { %s763_s19 = scalar_lea.vmem %s762_s18, 1536  ;;  %p764_p9 = scmp.lt.s32.totalorder %s883_s30, %s762_s18 }
  0x1c   : > { %p759_p10 = pnand %p757_p6, %p743_p11  ;;  %p765_p0 = scmp.lt.s32.totalorder %s763_s19, %s756_s11 }
  0x1e   : > { %p760_p12 = pneg %p759_p10  ;;  %p766_p1 = por %p765_p0, %p764_p9 }
  0x20   : > { %p767_p2 = pnand %p766_p1, %p760_p12 }
  0x22   : > { %770 = shalt.err (!%p767_p2)
}
  0x23   : > { %s808_s22 = smov 128   ;;  %s809_s23 = smov 8  }
  0x24   : > { %702 = dma.hbm_to_vmem [thread:$0]  (!%p874_p8), %s881_s28, 768, %s883_s30, %s886_s4, %s808_s22, %s808_s22, %s809_s23  }
  0x25   : > { %p154_p11 = scmp.lt.s32.totalorder %s805_s15, 3  ;;  %p973_p13 = scmp.ge.s32.totalorder %s805_s15, 1 }
  0x27   : > { %p155_p3 = pnand %p973_p13, %p154_p11 }
  0x28   : > { %s160_s24 = sand.u32 (!%p155_p3), 1, %s797_s13  }
  0x29   : > { %158 = sbr.rel (%p155_p3) target bundleno = 495 (0x1ef), region = 32  ;;  %s161_s27 = scalar_lea.sflag (!%p155_p3), [#allocation3], %s160_s24 }
  0x2a   : > { %s696_s26 = smul.u32 (!%p155_p3), 48, %s160_s24 }
  0x2c   : > { %s164_s29 = scalar_lea.vmem (!%p155_p3), [#allocation2], %s696_s26 }
  0x30   : > { %788 = dma.done.wait (%p868_p7), %s161_s27, 768  }
  0x31   : > { %790 = vsyncadd (%p868_p7), %s161_s27, 4294966528  ;;  %vm202_vm0 = vcmask 130048   ;;  %v200_v0 = vld [vmem:[%s968_s1] sm:$0xff]  ;;  %v201_v1 = vld [vmem:[%s968_s1 + $0x8] sm:$0xff]  ;;  %v810_v9 = vmov 0.0|0.0   ;;  %vm811_vm1 = vmmov 0  }
  0x32   : > { %v194_v2 = vld [vmem:[%s164_s29] sm:$0xff]  ;;  %v682_v3 = vpack.c.bf16 %v201_v1, %v200_v0  ;;  %v195_v4 = vld [vmem:[%s164_s29 + $0x8] sm:$0xff]  ;;  %v196_v5 = vld [vmem:[%s164_s29 + $0x10] sm:$0xff]  ;;  %686 = vmatprep.subr.bf16.mxu1 %v810_v9  ;;  %v812_v10 = vmov 0.0   ;;  %s188_s10 = smul.u32 3, %s609_s16  ;;  %vm538_vm2 = vcmask 27648  }
  0x33   : > { %652 = vmatprep.mubr.msk.f32.mxu0 %vm202_vm0, %v194_v2  ;;  %v197_v6 = vld [vmem:[%s164_s29 + $0x18] sm:$0xff]  ;;  %v198_v7 = vld [vmem:[%s164_s29 + $0x20] sm:$0xff]  ;;  %v199_v8 = vld [vmem:[%s164_s29 + $0x28] sm:$0xff]  ;;  %665 = vmatprep.mubr.msk.f32.mxu1 %vm811_vm1, %v812_v10 }
  0x34   : > { %683 = vmatprep.subr.bf16.mxu0 %v682_v3  ;;  %v316_v15 = vld [vmem:[%s969_s2] sm:$0xf]  ;;  %v317_v19 = vld [vmem:[%s969_s2 + $0x4] sm:$0xf]  ;;  %v318_v22 = vld [vmem:[%s969_s2 + $0x8] sm:$0xf] }
  0x35   : > { %685 = vmatpush3.bf16.msra.mxu0 %v682_v3  ;;  %p189_p7 = scmp.lt.s32.totalorder %s188_s10, 5 }
  0x37   : > { %s979_s10 = smov (!%p189_p7, %s188_s10), 5 }
  0x38   : > { %653 = vmatmul.mubr.msk.f32.vlgmr.msra.gmra.mrb[0].mxu0 %vm202_vm0, %v195_v4  ;;  %s616_s11 = sshll.u32 %s979_s10, 2 }
  0x39   : > { %655 = vmatprep.mubr.msk.f32.mxu0 %vm202_vm0, %v196_v5  ;;  %s192_s19 = scalar_lea.vmem %s970_s3, %s616_s11 }
  0x3c   : > { %656 = vmatmul.mubr.msk.f32.gmra.mrb[2].mxu0 %vm202_vm0, %v197_v6 }
  0x3d   : > { %658 = vmatprep.mubr.msk.f32.mxu0 %vm202_vm0, %v198_v7 }
  0x40   : > { %659 = vmatmul.mubr.msk.f32.gmra.mrb[4].mxu0 %vm202_vm0, %v199_v8 }
 0x10b   : > { %v654_v11 = vpop.f32.mrb[0].mxu0 }
 0x10c   : > { %v287_v12 = vpop.f32.mrb[1].mxu0 }
 0x10d   : > { %v687_v13 = vpack.c.bf16 %v654_v11, %v287_v12 }
 0x10f   : > { %v657_v14 = vpop.f32.mrb[2].mxu0  ;;  %688 = vmatpush3.bf16.msra.mxu1 %v687_v13 }
 0x110   : > { %v297_v16 = vpop.f32.mrb[3].mxu0  ;;  %689 = vmatprep.subr.bf16.mxu1 %v810_v9 }
 0x111   : > { %v690_v17 = vpack.c.bf16 %v657_v14, %v297_v16 }
 0x112   : > { %666 = vmatmul.mubr.msk.f32.vlgmr.msra.gmra.mrb[0].mxu1 %vm202_vm0, %v316_v15 }
 0x113   : > { %v660_v18 = vpop.f32.mrb[4].mxu0  ;;  %691 = vmatpush3.bf16.msra.mxu1 %v690_v17  ;;  %672 = vmatprep.mubr.msk.f32.mxu1 %vm811_vm1, %v812_v10 }
 0x114   : > { %v307_v20 = vpop.f32.mrb[5].mxu0  ;;  %692 = vmatprep.subr.bf16.mxu1 %v810_v9 }
 0x115   : > { %v693_v21 = vpack.c.bf16 %v660_v18, %v307_v20 }
 0x116   : > { %673 = vmatmul.mubr.msk.f32.vlgmr.msra.gmra.mrb[2].mxu1 %vm202_vm0, %v317_v19 }
 0x117   : > { %694 = vmatpush3.bf16.msra.mxu1 %v693_v21  ;;  %679 = vmatprep.mubr.msk.f32.mxu1 %vm811_vm1, %v812_v10 }
 0x11a   : > { %680 = vmatmul.mubr.msk.f32.vlgmr.msra.gmra.mrb[4].mxu1 %vm202_vm0, %v318_v22 }
 0x1e5   : > { %v388_v23 = vpop.f32.mrb[0].mxu1 }
 0x1e6   : > { %539 = vst.msk [vmem:[%s192_s19] sm:$0xf] %vm538_vm2, %v388_v23  ;;  %v667_v24 = vpop.f32.mrb[1].mxu1 }
 0x1e9   : > { %v461_v25 = vpop.f32.mrb[2].mxu1 }
 0x1ea   : > { %540 = vst.msk [vmem:[%s192_s19 + $0x4] sm:$0xf] %vm538_vm2, %v461_v25  ;;  %v674_v26 = vpop.f32.mrb[3].mxu1 }
 0x1ed   : > { %v534_v27 = vpop.f32.mrb[4].mxu1 }
 0x1ee   : > { %541 = vst.msk [vmem:[%s192_s19 + $0x8] sm:$0xf] %vm538_vm2, %v534_v27  ;;  %v681_v28 = vpop.f32.mrb[5].mxu1 }
 0x1ef PF: > { %p13_p8 = scmp.ge.s32.totalorder %s853_s17, 4   ;;  %s974_s12 = smov %s797_s13 }
 0x1f0   : > { %s975_s13 = smov %s801_s14  ;;  %s976_s14 = smov %s863_s20 }
 0x1f1   : > { %s977_s15 = smov %s853_s17  ;;  %15 = sbr.rel (!%p13_p8) target bundleno = 3 (0x3), region = 72 }
 0x1f8   :  { %564 = vsyncpa [#allocation3], 1 }
 0x1f9   :  { %566 = vsyncpa [#allocation3 + $0x1], 1 }

</bundles_post_ra>
